<compile_context>
chip_gen: v5e
topology: v5e:2x2
jax: 0.10.0
libtpu: 0.0.40
codegen_flags: <defaults>
</compile_context>

<pallas_src>
import functools

import jax
import jax.numpy as jnp
from jax.experimental import pallas as pl
from jax.experimental.pallas import tpu as pltpu


def ensemble_kernel(x_ref, p_ref, out_ref, *, n_batch, c_in):
    # x_ref  : VMEM [N*C_in, HW]  raw NCHW input, pure-reshaped (no transpose);
    #                             row n*C_in + c = channel c of batch image n, HW on lanes.
    # p_ref  : VMEM [R, C_in+2]   packed params: [:, :C_in] = W, [:, C_in] = bias,
    #                             [:, C_in+1] = per-row ensemble weight.
    # out_ref: SMEM [1, 1]        scalar result.
    hw = x_ref.shape[1]

    # Half-scale weights/bias (tiny [R,C_in] VPU work) so that
    # sigmoid(z) = 0.5*tanh(z/2) + 0.5 needs only ONE EUP op per element and no
    # per-element logit scaling.
    w_half = p_ref[:, 0:c_in] * 0.5            # [R, C_in]
    b_half = p_ref[:, c_in:c_in + 1] * 0.5     # [R, 1]
    wrow = p_ref[:, c_in + 1:c_in + 2]         # [R, 1]

    acc_t = None                               # sum over batch chunks of tanh(z/2), [R, HW]
    for n in range(n_batch):                   # static, N = 2 chunks of HW = 256 lanes
        row0 = n * c_in
        # z/2 = b/2 + sum_c (w[r,c]/2) * x[n,c,:]  -- VPU broadcast-FMAs, no MXU.
        # Bias initializes the accumulator (no separate epilogue add).
        z_half = b_half + w_half[:, 0:1] * x_ref[row0:row0 + 1, :]
        for c in range(1, c_in):               # static, C_in = 4
            z_half = z_half + w_half[:, c:c + 1] * x_ref[row0 + c:row0 + c + 1, :]
        t = jnp.tanh(z_half)                   # single EUP push per element
        acc_t = t if acc_t is None else acc_t + t

    # sum_j sigmoid(z_j) = 0.5 * sum_j tanh(z_j/2) + 0.5 * count   (per row)
    row_t = jnp.sum(acc_t, axis=1, keepdims=True)                  # [R, 1] one XLU lane-reduce
    row_sig_sum = 0.5 * row_t + 0.5 * jnp.float32(n_batch * hw)    # [R, 1]
    out_ref[0, 0] = jnp.sum(row_sig_sum * wrow)                    # tiny weighted row sum


@jax.jit
def ensemble_forward(x_nchw, conv_w, conv_b, ens_weights):
    """conv_w: [n_models, C_out, C_in] (1x1 kernels), conv_b: [n_models, C_out]."""
    n_models, c_out, c_in = conv_w.shape
    N, C, H, W = x_nchw.shape
    assert C == c_in
    HW = H * W
    R = n_models * c_out

    # Pure reshape, NO transpose / data movement: row n*C_in + c holds channel c of image n.
    x_flat = x_nchw.reshape(N * c_in, HW).astype(jnp.float32)

    # Pack all tiny per-row params into one VMEM operand (one DMA instead of three).
    w_flat = conv_w.reshape(R, c_in).astype(jnp.float32)           # row r = (model r//C_out, ch r%C_out)
    b_col = conv_b.reshape(R, 1).astype(jnp.float32)
    wrow = jnp.repeat(ens_weights.astype(jnp.float32), c_out).reshape(R, 1)
    params = jnp.concatenate([w_flat, b_col, wrow], axis=1)        # [R, C_in+2]

    cost = pl.CostEstimate(
        flops=2 * N * HW * c_in * R + 3 * N * HW * R,              # FMAs + acc/weighting
        transcendentals=N * HW * R,                                # one tanh per element
        bytes_accessed=4 * (N * c_in * HW + R * (c_in + 2) + 1),
    )

    kernel = functools.partial(ensemble_kernel, n_batch=N, c_in=c_in)
    out = pl.pallas_call(
        kernel,
        out_shape=jax.ShapeDtypeStruct((1, 1), jnp.float32),
        in_specs=[
            pl.BlockSpec(memory_space=pltpu.MemorySpace.VMEM),     # x      [N*C_in, HW]
            pl.BlockSpec(memory_space=pltpu.MemorySpace.VMEM),     # params [R, C_in+2]
        ],
        out_specs=pl.BlockSpec(memory_space=pltpu.MemorySpace.SMEM),
        cost_estimate=cost,
    )(x_flat, params)
    return out[0, 0]


def reference_forward(x_nchw, conv_w, conv_b, ens_weights):
    """Pure-JAX reference matching the PyTorch forward semantics."""
    total = jnp.float32(0.0)
    for i in range(conv_w.shape[0]):
        y = jnp.einsum("nchw,oc->nohw", x_nchw, conv_w[i]) \
            + conv_b[i][None, :, None, None]
        total = total + ens_weights[i] * jnp.sum(jax.nn.sigmoid(y))
    return total


if __name__ == "__main__":
    # Small shapes consistent with an NCHW conv ensemble.
    N, C_IN, H, W = 2, 4, 16, 16
    C_OUT = 8
    N_MODELS = 5

    key = jax.random.PRNGKey(0)
    kx, kw, kb = jax.random.split(key, 3)

    x = jax.random.normal(kx, (N, C_IN, H, W), dtype=jnp.float32)
    conv_w = 0.1 * jax.random.normal(kw, (N_MODELS, C_OUT, C_IN), dtype=jnp.float32)
    conv_b = 0.1 * jax.random.normal(kb, (N_MODELS, C_OUT), dtype=jnp.float32)
    ens_weights = jnp.full((N_MODELS,), 0.2, dtype=jnp.float32)  # [0.2]*5

    # TODO(synk): optional post_process_func hook of EnsembleModel is not
    # translated (default None path -> scalar sum, implemented here).

    result = ensemble_forward(x, conv_w, conv_b, ens_weights)
    result = jax.block_until_ready(result)

    ref = reference_forward(x, conv_w, conv_b, ens_weights)
    assert jnp.allclose(result, ref, rtol=1e-4, atol=1e-3), (result, ref)

    print("KERNEL_OK")
</pallas_src>

<mosaic_0001>
module attributes {stable_mosaic.version = 11 : i64} {
  func.func @ensemble_kernel(%arg0: memref<8x256xf32, #tpu.memory_space<vmem>>, %arg1: memref<40x6xf32, #tpu.memory_space<vmem>>, %arg2: memref<1x1xf32, #tpu.memory_space<smem>>) attributes {dimension_semantics = [], scalar_prefetch = 0 : i64, scratch_operands = 0 : i64, tpu.core_type = #tpu.core_type<tc>} {
    %c0 = arith.constant 0 : index
    %c0_0 = arith.constant 0 : index
    %0 = vector.load %arg1[%c0, %c0_0] : memref<40x6xf32, #tpu.memory_space<vmem>>, vector<40x4xf32>
    %cst = arith.constant 5.000000e-01 : f32
    %1 = vector.broadcast %cst : f32 to vector<40x4xf32>
    %2 = arith.mulf %0, %1 : vector<40x4xf32>
    %c0_1 = arith.constant 0 : index
    %c4 = arith.constant 4 : index
    %3 = vector.load %arg1[%c0_1, %c4] : memref<40x6xf32, #tpu.memory_space<vmem>>, vector<40x1xf32>
    %cst_2 = arith.constant 5.000000e-01 : f32
    %4 = vector.broadcast %cst_2 : f32 to vector<40x1xf32>
    %5 = arith.mulf %3, %4 : vector<40x1xf32>
    %c0_3 = arith.constant 0 : index
    %c5 = arith.constant 5 : index
    %6 = vector.load %arg1[%c0_3, %c5] : memref<40x6xf32, #tpu.memory_space<vmem>>, vector<40x1xf32>
    %7 = vector.extract_strided_slice %2 {offsets = [0, 0], sizes = [40, 1], strides = [1, 1]} : vector<40x4xf32> to vector<40x1xf32>
    %c0_4 = arith.constant 0 : index
    %c0_5 = arith.constant 0 : index
    %8 = vector.load %arg0[%c0_4, %c0_5] : memref<8x256xf32, #tpu.memory_space<vmem>>, vector<1x256xf32>
    %9 = vector.broadcast %7 : vector<40x1xf32> to vector<40x256xf32>
    %10 = vector.broadcast %8 : vector<1x256xf32> to vector<40x256xf32>
    %11 = arith.mulf %9, %10 : vector<40x256xf32>
    %12 = vector.broadcast %5 : vector<40x1xf32> to vector<40x256xf32>
    %13 = arith.addf %12, %11 : vector<40x256xf32>
    %14 = vector.extract_strided_slice %2 {offsets = [0, 1], sizes = [40, 1], strides = [1, 1]} : vector<40x4xf32> to vector<40x1xf32>
    %c1 = arith.constant 1 : index
    %c0_6 = arith.constant 0 : index
    %15 = vector.load %arg0[%c1, %c0_6] : memref<8x256xf32, #tpu.memory_space<vmem>>, vector<1x256xf32>
    %16 = vector.broadcast %14 : vector<40x1xf32> to vector<40x256xf32>
    %17 = vector.broadcast %15 : vector<1x256xf32> to vector<40x256xf32>
    %18 = arith.mulf %16, %17 : vector<40x256xf32>
    %19 = arith.addf %13, %18 : vector<40x256xf32>
    %20 = vector.extract_strided_slice %2 {offsets = [0, 2], sizes = [40, 1], strides = [1, 1]} : vector<40x4xf32> to vector<40x1xf32>
    %c2 = arith.constant 2 : index
    %c0_7 = arith.constant 0 : index
    %21 = vector.load %arg0[%c2, %c0_7] : memref<8x256xf32, #tpu.memory_space<vmem>>, vector<1x256xf32>
    %22 = vector.broadcast %20 : vector<40x1xf32> to vector<40x256xf32>
    %23 = vector.broadcast %21 : vector<1x256xf32> to vector<40x256xf32>
    %24 = arith.mulf %22, %23 : vector<40x256xf32>
    %25 = arith.addf %19, %24 : vector<40x256xf32>
    %26 = vector.extract_strided_slice %2 {offsets = [0, 3], sizes = [40, 1], strides = [1, 1]} : vector<40x4xf32> to vector<40x1xf32>
    %c3 = arith.constant 3 : index
    %c0_8 = arith.constant 0 : index
    %27 = vector.load %arg0[%c3, %c0_8] : memref<8x256xf32, #tpu.memory_space<vmem>>, vector<1x256xf32>
    %28 = vector.broadcast %26 : vector<40x1xf32> to vector<40x256xf32>
    %29 = vector.broadcast %27 : vector<1x256xf32> to vector<40x256xf32>
    %30 = arith.mulf %28, %29 : vector<40x256xf32>
    %31 = arith.addf %25, %30 : vector<40x256xf32>
    %32 = math.tanh %31 : vector<40x256xf32>
    %33 = vector.extract_strided_slice %2 {offsets = [0, 0], sizes = [40, 1], strides = [1, 1]} : vector<40x4xf32> to vector<40x1xf32>
    %c4_9 = arith.constant 4 : index
    %c0_10 = arith.constant 0 : index
    %34 = vector.load %arg0[%c4_9, %c0_10] : memref<8x256xf32, #tpu.memory_space<vmem>>, vector<1x256xf32>
    %35 = vector.broadcast %33 : vector<40x1xf32> to vector<40x256xf32>
    %36 = vector.broadcast %34 : vector<1x256xf32> to vector<40x256xf32>
    %37 = arith.mulf %35, %36 : vector<40x256xf32>
    %38 = vector.broadcast %5 : vector<40x1xf32> to vector<40x256xf32>
    %39 = arith.addf %38, %37 : vector<40x256xf32>
    %40 = vector.extract_strided_slice %2 {offsets = [0, 1], sizes = [40, 1], strides = [1, 1]} : vector<40x4xf32> to vector<40x1xf32>
    %c5_11 = arith.constant 5 : index
    %c0_12 = arith.constant 0 : index
    %41 = vector.load %arg0[%c5_11, %c0_12] : memref<8x256xf32, #tpu.memory_space<vmem>>, vector<1x256xf32>
    %42 = vector.broadcast %40 : vector<40x1xf32> to vector<40x256xf32>
    %43 = vector.broadcast %41 : vector<1x256xf32> to vector<40x256xf32>
    %44 = arith.mulf %42, %43 : vector<40x256xf32>
    %45 = arith.addf %39, %44 : vector<40x256xf32>
    %46 = vector.extract_strided_slice %2 {offsets = [0, 2], sizes = [40, 1], strides = [1, 1]} : vector<40x4xf32> to vector<40x1xf32>
    %c6 = arith.constant 6 : index
    %c0_13 = arith.constant 0 : index
    %47 = vector.load %arg0[%c6, %c0_13] : memref<8x256xf32, #tpu.memory_space<vmem>>, vector<1x256xf32>
    %48 = vector.broadcast %46 : vector<40x1xf32> to vector<40x256xf32>
    %49 = vector.broadcast %47 : vector<1x256xf32> to vector<40x256xf32>
    %50 = arith.mulf %48, %49 : vector<40x256xf32>
    %51 = arith.addf %45, %50 : vector<40x256xf32>
    %52 = vector.extract_strided_slice %2 {offsets = [0, 3], sizes = [40, 1], strides = [1, 1]} : vector<40x4xf32> to vector<40x1xf32>
    %c7 = arith.constant 7 : index
    %c0_14 = arith.constant 0 : index
    %53 = vector.load %arg0[%c7, %c0_14] : memref<8x256xf32, #tpu.memory_space<vmem>>, vector<1x256xf32>
    %54 = vector.broadcast %52 : vector<40x1xf32> to vector<40x256xf32>
    %55 = vector.broadcast %53 : vector<1x256xf32> to vector<40x256xf32>
    %56 = arith.mulf %54, %55 : vector<40x256xf32>
    %57 = arith.addf %51, %56 : vector<40x256xf32>
    %58 = math.tanh %57 : vector<40x256xf32>
    %59 = arith.addf %32, %58 : vector<40x256xf32>
    %cst_15 = arith.constant dense<0.000000e+00> : vector<40xf32>
    %60 = vector.multi_reduction <add>, %59, %cst_15 [1] : vector<40x256xf32> to vector<40xf32>
    %61 = vector.shape_cast %60 : vector<40xf32> to vector<40x1xf32>
    %cst_16 = arith.constant 5.000000e-01 : f32
    %62 = vector.broadcast %cst_16 : f32 to vector<40x1xf32>
    %63 = arith.mulf %62, %61 : vector<40x1xf32>
    %cst_17 = arith.constant 5.000000e-01 : f32
    %cst_18 = arith.constant 5.120000e+02 : f32
    %64 = arith.mulf %cst_17, %cst_18 : f32
    %65 = vector.broadcast %64 : f32 to vector<40x1xf32>
    %66 = arith.addf %63, %65 : vector<40x1xf32>
    %67 = arith.mulf %66, %6 : vector<40x1xf32>
    %68 = vector.shape_cast %67 : vector<40x1xf32> to vector<1x40x1xf32>
    %cst_19 = arith.constant dense<0.000000e+00> : vector<1xf32>
    %69 = vector.multi_reduction <add>, %68, %cst_19 [1, 2] : vector<1x40x1xf32> to vector<1xf32>
    %70 = vector.shape_cast %69 : vector<1xf32> to vector<1x1x1xf32>
    %71 = vector.extract %70[0, 0, 0] : f32 from vector<1x1x1xf32>
    %c0_20 = arith.constant 0 : index
    %c0_21 = arith.constant 0 : index
    %72 = memref.load %arg2[%c0_20, %c0_21] : memref<1x1xf32, #tpu.memory_space<smem>>
    memref.store %71, %arg2[%c0_20, %c0_21] : memref<1x1xf32, #tpu.memory_space<smem>>
    return
  }
}

</mosaic_0001>

<bundles_post_ra>
// kernel: ensemble_forward.1
= control target key start
LH: loop header
LB: loop body
LE: loop exit
PB: predicated region body
PF: predicated region fallthrough
CT: control target
= control target key end

     0   :  { %v550_v3 = vmov 0   ;;  %v551_v7 = vmov 4   ;;  %s809_s0 = inlined_call_operand.vmem [shape: f32[8,256], index: 0, kind: input, shape index: {}]   ;;  %s810_s1 = inlined_call_operand.vmem [shape: f32[40,6], index: 1, kind: input, shape index: {}]   ;;  %s811_s2 = inlined_call_operand.hbm [shape: f32[1,1], index: 2, kind: output, shape index: {}]  }
   0x1   :  { %v575_v0 = vld [vmem:[%s810_s1 + $0x10] sm:$0xff]  ;;  %v580_v1 = vld [vmem:[%s810_s1] sm:$0xff]  ;;  %v585_v2 = vld [vmem:[%s810_s1 + $0x8] sm:$0xff]  ;;  %475 = vset.pattern.permute.xlu1 %v550_v3  ;;  %474 = vset.pattern.permute.xlu0 %v550_v3 }
   0x2   :  { %v19_v4 = vmul.f32 0.5, %v575_v0  ;;  %v17_v5 = vmul.f32 0.5, %v580_v1  ;;  %v18_v6 = vmul.f32 0.5, %v585_v2  ;;  %477 = vset.pattern.permute.xlu2 %v551_v7 }
   0x3   :  { %7 = vsyncpa [#allocation3], 0  ;;  %v552_v8 = vmov 1   ;;  %v593_v9 = vld [vmem:[%s810_s1 + $0x18] sm:$0xff]  ;;  %v553_v11 = vmov 2   ;;  %v599_v12 = vld [vmem:[%s810_s1 + $0x20] sm:$0xff] }
   0x4   :  { %35 = vperm.xlu1 %475, %v19_v4   ;;  %25 = vperm.xlu0 %474, %v17_v5   ;;  %814 = vst [vmem:[#allocation5_spill] sm:$0xff] %v593_v9  ;;  %v20_v10 = vmul.f32 0.5, %v593_v9  ;;  %v21_v13 = vmul.f32 0.5, %v599_v12  ;;  %v554_v14 = vmov 3   ;;  %vm422_vm0 = vcmask 7168   ;;  %s448_s8 = sshll.u32 %s811_s2, 4  ;;  %s449_s8 = int_to_ptr.hbm [resolvable:$true] %s448_s8 }
   0x5   :  { %68 = vperm.xlu2 %477, %v18_v6   ;;  %815 = vst [vmem:[#allocation6_spill] sm:$0xff] %v599_v12  ;;  %v458_v24 = vld [vmem:[%s809_s0 + $0x1] ss:$8 sm:$0x3]  ;;  %s556_s10 = smov [#allocation2]  }
   0x6   :  { %v22_v25 = vld [vmem:[%s809_s0] ss:$8 sm:$0x3]  ;;  %v461_v26 = vld [vmem:[%s809_s0 + $0x4] ss:$8 sm:$0x3] }
   0x7   :  { %v462_v28 = vld [vmem:[%s809_s0 + $0x5] ss:$8 sm:$0x3]  ;;  %v624_v30 = vperm.slane %v458_v24, 0  ;;  %v626_v31 = vperm.slane %v22_v25, 0  ;;  %v628_v32 = vperm.slane %v22_v25, 1 }
   0x8   :  { %v630_v33 = vperm.slane %v458_v24, 1  ;;  %v632_v34 = vperm.slane %v461_v26, 0  ;;  %v634_v35 = vperm.slane %v461_v26, 1  ;;  %v459_v36 = vld [vmem:[%s809_s0 + $0x2] ss:$8 sm:$0x3] }
   0x9   :  { %v639_v37 = vperm.slane %v462_v28, 0  ;;  %v641_v38 = vperm.slane %v462_v28, 1  ;;  %v463_v41 = vld [vmem:[%s809_s0 + $0x6] ss:$8 sm:$0x3]  ;;  %v652_v45 = vperm.slane %v459_v36, 0 }
   0xa   :  { %v654_v46 = vperm.slane %v459_v36, 1  ;;  %v460_v47 = vld [vmem:[%s809_s0 + $0x3] ss:$8 sm:$0x3]  ;;  %v661_v50 = vperm.slane %v463_v41, 0  ;;  %v663_v51 = vperm.slane %v463_v41, 1 }
   0xb   :  { %v669_v59 = vperm.slane %v460_v47, 0  ;;  %v671_v60 = vperm.slane %v460_v47, 1 }
   0xc   :  { %476 = vset.pattern.permute.xlu1 %v551_v7  ;;  %30 = vperm.xlu0 %474, %v18_v6  }
   0xd   :  { %478 = vset.pattern.permute.xlu2 %v552_v8  ;;  %64 = vperm.xlu1 %476, %v17_v5  }
   0xe   :  { %96 = vperm.xlu2 %478, %v17_v5  }
  0x14   :  { %479 = vset.pattern.permute.xlu0 %v552_v8 }
  0x15   :  { %480 = vset.pattern.permute.xlu1 %v550_v3  ;;  %100 = vperm.xlu0 %479, %v18_v6  }
  0x16   :  { %481 = vset.pattern.permute.xlu2 %v551_v7  ;;  %40 = vperm.xlu1 %480, %v20_v10  }
  0x17   :  { %72 = vperm.xlu2 %481, %v19_v4  }
  0x1d   :  { %484 = vset.pattern.permute.xlu0 %v553_v11 }
  0x1e   :  { %482 = vset.pattern.permute.xlu1 %v552_v8  ;;  %147 = vperm.xlu0 %484, %v18_v6  }
  0x1f   :  { %483 = vset.pattern.permute.xlu2 %v553_v11  ;;  %104 = vperm.xlu1 %482, %v19_v4  }
  0x20   :  { %143 = vperm.xlu2 %483, %v17_v5  }
  0x26   :  { %489 = vset.pattern.permute.xlu0 %v554_v14 }
  0x27   :  { %485 = vset.pattern.permute.xlu1 %v550_v3  ;;  %190 = vperm.xlu0 %489, %v17_v5  }
  0x28   :  { %486 = vset.pattern.permute.xlu2 %v551_v7  ;;  %45 = vperm.xlu1 %485, %v21_v13  }
  0x29   :  { %76 = vperm.xlu2 %486, %v20_v10  }
  0x2f   :  { %198 = vperm.xlu0 %489, %v19_v4  }
  0x30   :  { %487 = vset.pattern.permute.xlu1 %v552_v8 }
  0x31   :  { %488 = vset.pattern.permute.xlu2 %v553_v11  ;;  %108 = vperm.xlu1 %487, %v20_v10  }
  0x32   :  { %151 = vperm.xlu2 %488, %v19_v4  }
  0x37   :  { %206 = vperm.xlu0 %489, %v21_v13  }
  0x39   :  { %490 = vset.pattern.permute.xlu1 %v554_v14 }
  0x3a   :  { %491 = vset.pattern.permute.xlu2 %v551_v7  ;;  %194 = vperm.xlu1 %490, %v18_v6  }
  0x3b   :  { %80 = vperm.xlu2 %491, %v21_v13  }
  0x42   :  { %492 = vset.pattern.permute.xlu1 %v552_v8 }
  0x43   :  { %493 = vset.pattern.permute.xlu2 %v553_v11  ;;  %112 = vperm.xlu1 %492, %v21_v13  }
  0x44   :  { %155 = vperm.xlu2 %493, %v20_v10  }
  0x4b   :  { %494 = vset.pattern.permute.xlu1 %v553_v11 }
  0x4c   :  { %495 = vset.pattern.permute.xlu2 %v554_v14  ;;  %159 = vperm.xlu1 %494, %v21_v13  }
  0x4d   :  { %202 = vperm.xlu2 %495, %v20_v10   ;;  %v464_v10 = vld [vmem:[%s809_s0 + $0x7] ss:$8 sm:$0x3]  ;;  %s555_s0 = smov 123  }
  0x4e   :  { %v692_v36 = vperm.slane %v464_v10, 0 }
  0x5f   :  { %v602_v15 = vpop.permute.xlu2 %68 }
  0x68   :  { %v97_v16 = vpop.permute.xlu2 %96 }
  0x69   :  { %v120_v48 = vmul.f32 %v624_v30, %v97_v16  ;;  %v121_v49 = vmul.f32 %v630_v33, %v97_v16  ;;  %v278_v52 = vmul.f32 %v639_v37, %v97_v16  ;;  %v279_v53 = vmul.f32 %v641_v38, %v97_v16 }
  0x71   :  { %v604_v17 = vpop.permute.xlu2 %72 }
  0x76   :  { %v36_v18 = vpop.permute.xlu1 %35  ;;  %v26_v19 = vpop.permute.xlu0 %25 }
  0x77   :  { %v53_v39 = vmul.f32 %v626_v31, %v26_v19  ;;  %v54_v40 = vmul.f32 %v628_v32, %v26_v19  ;;  %v251_v42 = vmul.f32 %v632_v34, %v26_v19  ;;  %v252_v43 = vmul.f32 %v634_v35, %v26_v19 }
  0x78   :  { %v57_v61 = vmul.f32 %v626_v31, %v36_v18  ;;  %v58_v62 = vmul.f32 %v628_v32, %v36_v18  ;;  %v255_v63 = vmul.f32 %v632_v34, %v36_v18  ;;  %v256_v3 = vmul.f32 %v634_v35, %v36_v18 }
  0x7a   :  { %v144_v20 = vpop.permute.xlu2 %143  ;;  %v87_v25 = vadd.f32 %v604_v17, %v57_v61  ;;  %v88_v26 = vadd.f32 %v604_v17, %v58_v62 }
  0x7b   :  { %v167_v7 = vmul.f32 %v652_v45, %v144_v20  ;;  %v168_v8 = vmul.f32 %v654_v46, %v144_v20  ;;  %v305_v18 = vmul.f32 %v661_v50, %v144_v20  ;;  %v306_v19 = vmul.f32 %v663_v51, %v144_v20 }
  0x7e   :  { %v31_v21 = vpop.permute.xlu0 %30 }
  0x7f   :  { %v65_v22 = vpop.permute.xlu1 %64  ;;  %v55_v5 = vmul.f32 %v626_v31, %v31_v21  ;;  %v56_v6 = vmul.f32 %v628_v32, %v31_v21  ;;  %v253_v11 = vmul.f32 %v632_v34, %v31_v21  ;;  %v254_v13 = vmul.f32 %v634_v35, %v31_v21 }
  0x80   :  { %v83_v54 = vadd.f32 %v65_v22, %v53_v39  ;;  %v84_v55 = vadd.f32 %v65_v22, %v54_v40  ;;  %v261_v56 = vadd.f32 %v251_v42, %v65_v22  ;;  %v262_v57 = vadd.f32 %v252_v43, %v65_v22 }
  0x81   :  { %v694_v39 = vperm.slane %v464_v10, 1  ;;  %v265_v21 = vadd.f32 %v255_v63, %v604_v17  ;;  %v266_v40 = vadd.f32 %v256_v3, %v604_v17  ;;  %v85_v41 = vadd.f32 %v602_v15, %v55_v5 }
  0x82   :  { %v130_v14 = vadd.f32 %v120_v48, %v83_v54  ;;  %v131_v16 = vadd.f32 %v121_v49, %v84_v55  ;;  %v288_v22 = vadd.f32 %v278_v52, %v261_v56  ;;  %v289_v24 = vadd.f32 %v279_v53, %v262_v57 }
  0x83   :  { %v606_v23 = vpop.permute.xlu2 %76  ;;  %v86_v20 = vadd.f32 %v602_v15, %v56_v6  ;;  %v701_v42 = vadd.f32 %v253_v11, %v602_v15  ;;  %v704_v43 = vadd.f32 %v254_v13, %v602_v15 }
  0x84   :  { %v177_v47 = vadd.f32 %v167_v7, %v130_v14  ;;  %v178_v48 = vadd.f32 %v168_v8, %v131_v16  ;;  %v315_v53 = vadd.f32 %v305_v18, %v288_v22  ;;  %v316_v17 = vadd.f32 %v306_v19, %v289_v24 }
  0x87   :  { %v617_v27 = vpop.permute.xlu0 %100 }
  0x88   :  { %v622_v29 = vpop.permute.xlu1 %40  ;;  %v122_v49 = vmul.f32 %v624_v30, %v617_v27  ;;  %v123_v52 = vmul.f32 %v630_v33, %v617_v27  ;;  %v712_v54 = vmul.f32 %v639_v37, %v617_v27 }
  0x89   :  { %v59_v6 = vmul.f32 %v626_v31, %v622_v29  ;;  %v60_v12 = vmul.f32 %v628_v32, %v622_v29  ;;  %v257_v9 = vmul.f32 %v632_v34, %v622_v29 }
  0x8c   :  { %v650_v44 = vpop.permute.xlu2 %151 }
  0x8d   :  { %v171_v7 = vmul.f32 %v652_v45, %v650_v44  ;;  %v172_v8 = vmul.f32 %v654_v46, %v650_v44  ;;  %v309_v11 = vmul.f32 %v661_v50, %v650_v44 }
  0x90   :  { %v667_v58 = vpop.permute.xlu0 %147 }
  0x91   :  { %v105_v4 = vpop.permute.xlu1 %104 }
  0x92   :  { %v124_v55 = vmul.f32 %v624_v30, %v105_v4  ;;  %v125_v56 = vmul.f32 %v630_v33, %v105_v4  ;;  %v282_v15 = vmul.f32 %v639_v37, %v105_v4  ;;  %v283_v10 = vmul.f32 %v641_v38, %v105_v4 }
  0x94   :  { %v134_v18 = vadd.f32 %v124_v55, %v87_v25  ;;  %v135_v19 = vadd.f32 %v125_v56, %v88_v26  ;;  %v292_v22 = vadd.f32 %v282_v15, %v265_v21  ;;  %v310_v25 = vmul.f32 %v663_v51, %v650_v44 }
  0x95   :  { %v690_v28 = vpop.permute.xlu2 %80  ;;  %v293_v26 = vadd.f32 %v283_v10, %v266_v40  ;;  %v132_v21 = vadd.f32 %v122_v49, %v85_v41  ;;  %v90_v40 = vadd.f32 %v606_v23, %v60_v12  ;;  %v267_v41 = vadd.f32 %v257_v9, %v606_v23 }
  0x96   :  { %v319_v55 = vadd.f32 %v309_v11, %v292_v22  ;;  %v169_v9 = vmul.f32 %v652_v45, %v667_v58 }
  0x97   :  { %v320_v49 = vadd.f32 %v310_v25, %v293_v26 }
  0x99   :  { %v191_v57 = vpop.permute.xlu0 %190 }
  0x9a   :  { %v214_v61 = vmul.f32 %v669_v59, %v191_v57  ;;  %v215_v62 = vmul.f32 %v671_v60, %v191_v57  ;;  %v332_v63 = vmul.f32 %v692_v36, %v191_v57  ;;  %v333_v3 = vmul.f32 %v694_v39, %v191_v57  ;;  %v721_v5 = vpop.permute.xlu1 %45 }
  0x9b   :  { %v281_v57 = vmul.f32 %v641_v38, %v617_v27  ;;  %v89_v27 = vadd.f32 %v606_v23, %v59_v6 }
  0x9c   :  { %v224_v13 = vadd.f32 %v214_v61, %v177_v47  ;;  %v225_v14 = vadd.f32 %v215_v62, %v178_v48  ;;  %v342_v16 = vadd.f32 %v332_v63, %v315_v53  ;;  %v343_v24 = vadd.f32 %v333_v3, %v316_v17 }
  0x9d   :  { %v258_v47 = vmul.f32 %v634_v35, %v622_v29  ;;  %v133_v48 = vadd.f32 %v123_v52, %v86_v20  ;;  %v181_v53 = vadd.f32 %v171_v7, %v134_v18  ;;  %v182_v17 = vadd.f32 %v172_v8, %v135_v19 }
  0x9e   :  { %496 = vtanh.f32 %v224_v13  ;;  %v156_v4 = vpop.permute.xlu2 %155  ;;  %v308_v19 = vmul.f32 %v663_v51, %v667_v58 }
  0x9f   :  { %498 = vtanh.f32 %v225_v14  ;;  %v268_v20 = vadd.f32 %v258_v47, %v606_v23  ;;  %v173_v63 = vmul.f32 %v652_v45, %v156_v4  ;;  %v170_v23 = vmul.f32 %v654_v46, %v667_v58 }
  0xa0   :  { %500 = vtanh.f32 %v342_v16  ;;  %v307_v16 = vmul.f32 %v661_v50, %v667_v58  ;;  %v174_v25 = vmul.f32 %v654_v46, %v156_v4  ;;  %v311_v26 = vmul.f32 %v661_v50, %v156_v4 }
  0xa1   :  { %502 = vtanh.f32 %v343_v24  ;;  %v199_v56 = vpop.permute.xlu0 %198  ;;  %v291_v58 = vadd.f32 %v281_v57, %v704_v43 }
  0xa2   :  { %v218_v15 = vmul.f32 %v669_v59, %v199_v56  ;;  %v219_v61 = vmul.f32 %v671_v60, %v199_v56  ;;  %v336_v29 = vmul.f32 %v692_v36, %v199_v56  ;;  %v337_v44 = vmul.f32 %v694_v39, %v199_v56 }
  0xa3   :  { %v109_v52 = vpop.permute.xlu1 %108 }
  0xa4   :  { %v497_v62 = vpop.eup %496  ;;  %v228_v3 = vadd.f32 %v218_v15, %v181_v53  ;;  %v229_v6 = vadd.f32 %v219_v61, %v182_v17  ;;  %v346_v7 = vadd.f32 %v336_v29, %v319_v55  ;;  %v347_v10 = vadd.f32 %v337_v44, %v320_v49 }
  0xa5   :  { %v499_v8 = vpop.eup %498  ;;  %v126_v11 = vmul.f32 %v624_v30, %v109_v52  ;;  %v127_v13 = vmul.f32 %v630_v33, %v109_v52  ;;  %v284_v12 = vmul.f32 %v639_v37, %v109_v52  ;;  %v285_v24 = vmul.f32 %v641_v38, %v109_v52 }
  0xa6   :  { %v501_v14 = vpop.eup %500  ;;  %504 = vtanh.f32 %v228_v3  ;;  %v290_v15 = vadd.f32 %v712_v54, %v701_v42  ;;  %v180_v29 = vadd.f32 %v170_v23, %v133_v48  ;;  %v312_v44 = vmul.f32 %v663_v51, %v156_v4 }
  0xa7   :  { %v503_v18 = vpop.eup %502  ;;  %506 = vtanh.f32 %v229_v6  ;;  %v136_v22 = vadd.f32 %v126_v11, %v89_v27  ;;  %v203_v47 = vpop.permute.xlu2 %202  ;;  %v137_v17 = vadd.f32 %v127_v13, %v90_v40  ;;  %v294_v55 = vadd.f32 %v284_v12, %v267_v41 }
  0xa8   :  { %508 = vtanh.f32 %v346_v7  ;;  %v220_v53 = vmul.f32 %v669_v59, %v203_v47  ;;  %v179_v27 = vadd.f32 %v169_v9, %v132_v21  ;;  %v362_v61 = vadd.f32 %v501_v14, %v497_v62 }
  0xa9   :  { %510 = vtanh.f32 %v347_v10  ;;  %v183_v56 = vadd.f32 %v173_v63, %v136_v22  ;;  %v295_v49 = vadd.f32 %v285_v24, %v268_v20  ;;  %v363_v52 = vadd.f32 %v503_v18, %v499_v8 }
  0xaa   :  { %v317_v6 = vadd.f32 %v307_v16, %v290_v15  ;;  %v318_v7 = vadd.f32 %v308_v19, %v291_v58  ;;  %v221_v10 = vmul.f32 %v671_v60, %v203_v47  ;;  %v184_v11 = vadd.f32 %v174_v25, %v137_v17 }
  0xab   :  { %v230_v40 = vadd.f32 %v220_v53, %v183_v56  ;;  %v321_v13 = vadd.f32 %v311_v26, %v294_v55  ;;  %v372_v42 = vadd.f32 %v363_v52, %v362_v61  ;;  %v338_v57 = vmul.f32 %v692_v36, %v203_v47 }
  0xac   :  { %v505_v3 = vpop.eup %504  ;;  %v195_v41 = vpop.permute.xlu1 %194  ;;  %v322_v62 = vadd.f32 %v312_v44, %v295_v49  ;;  %v339_v8 = vmul.f32 %v694_v39, %v203_v47  ;;  %v231_v18 = vadd.f32 %v221_v10, %v184_v11  ;;  %v61_v55 = vmul.f32 %v626_v31, %v721_v5 }
  0xad   :  { %v507_v63 = vpop.eup %506  ;;  %v216_v43 = vmul.f32 %v669_v59, %v195_v41  ;;  %v217_v4 = vmul.f32 %v671_v60, %v195_v41  ;;  %v334_v21 = vmul.f32 %v692_v36, %v195_v41  ;;  %v335_v48 = vmul.f32 %v694_v39, %v195_v41  ;;  %373 = vadd.xlane.f32.xlu1 %v372_v42  ;;  %v207_v44 = vpop.permute.xlu0 %206 }
  0xae   :  { %v509_v54 = vpop.eup %508  ;;  %512 = vtanh.f32 %v230_v40  ;;  %v348_v22 = vadd.f32 %v338_v57, %v321_v13  ;;  %v349_v24 = vadd.f32 %v339_v8, %v322_v62  ;;  %v62_v56 = vmul.f32 %v628_v32, %v721_v5 }
  0xaf   :  { %v511_v20 = vpop.eup %510  ;;  %v226_v12 = vadd.f32 %v216_v43, %v179_v27  ;;  %v366_v14 = vadd.f32 %v509_v54, %v505_v3  ;;  %v227_v9 = vadd.f32 %v217_v4, %v180_v29  ;;  %v344_v23 = vadd.f32 %v334_v21, %v317_v6 }
  0xb0   :  { %v345_v16 = vadd.f32 %v335_v48, %v318_v7  ;;  %v367_v19 = vadd.f32 %v511_v20, %v507_v63  ;;  %v259_v15 = vmul.f32 %v632_v34, %v721_v5  ;;  %v260_v58 = vmul.f32 %v634_v35, %v721_v5 }
  0xb1   :  { %514 = vtanh.f32 %v226_v12  ;;  %v91_v34 = vadd.f32 %v690_v28, %v61_v55  ;;  %v92_v10 = vadd.f32 %v690_v28, %v62_v56  ;;  %v222_v40 = vmul.f32 %v669_v59, %v207_v44 }
  0xb2   :  { %516 = vtanh.f32 %v227_v9  ;;  %v378_v25 = vadd.f32 %v367_v19, %v366_v14  ;;  %v269_v35 = vadd.f32 %v259_v15, %v690_v28  ;;  %v340_v57 = vmul.f32 %v692_v36, %v207_v44 }
  0xb3   :  { %518 = vtanh.f32 %v344_v23  ;;  %v341_v8 = vmul.f32 %v694_v39, %v207_v44 }
  0xb4   :  { %520 = vtanh.f32 %v345_v16  ;;  %379 = vadd.xlane.f32.xlu0 %v378_v25  ;;  %v513_v47 = vpop.eup %512 }
  0xb5   :  { %522 = vtanh.f32 %v231_v18  ;;  %v113_v26 = vpop.permute.xlu1 %112 }
  0xb6   :  { %524 = vtanh.f32 %v348_v22  ;;  %v128_v61 = vmul.f32 %v624_v30, %v113_v26  ;;  %v129_v49 = vmul.f32 %v630_v33, %v113_v26  ;;  %v286_v52 = vmul.f32 %v639_v37, %v113_v26 }
  0xb7   :  { %v515_v53 = vpop.eup %514  ;;  %526 = vtanh.f32 %v349_v24  ;;  %v287_v31 = vmul.f32 %v641_v38, %v113_v26  ;;  %v270_v30 = vadd.f32 %v260_v58, %v690_v28  ;;  %v223_v28 = vmul.f32 %v671_v60, %v207_v44 }
  0xb8   :  { %v517_v17 = vpop.eup %516  ;;  %v138_v41 = vadd.f32 %v128_v61, %v91_v34  ;;  %v139_v37 = vadd.f32 %v129_v49, %v92_v10  ;;  %v296_v63 = vadd.f32 %v286_v52, %v269_v35 }
  0xb9   :  { %v519_v27 = vpop.eup %518  ;;  %v297_v38 = vadd.f32 %v287_v31, %v270_v30  ;;  %v817_v31 = vld [vmem:[#allocation6_spill] sm:$0xff] }
  0xba   :  { %v521_v29 = vpop.eup %520  ;;  %v364_v3 = vadd.f32 %v519_v27, %v515_v53 }
  0xbb   :  { %v523_v6 = vpop.eup %522  ;;  %v365_v32 = vadd.f32 %v521_v29, %v517_v17  ;;  %v816_v29 = vld [vmem:[#allocation5_spill] sm:$0xff] }
  0xbc   :  { %v525_v7 = vpop.eup %524 }
  0xbd   :  { %v527_v5 = vpop.eup %526  ;;  %v375_v33 = vadd.f32 %v365_v32, %v364_v3  ;;  %v368_v59 = vadd.f32 %v525_v7, %v513_v47 }
  0xbe   :  { %v160_v11 = vpop.permute.xlu1 %159  ;;  %v369_v4 = vadd.f32 %v527_v5, %v523_v6 }
  0xbf   :  { %376 = vadd.xlane.f32.xlu2 %v375_v33  ;;  %v175_v13 = vmul.f32 %v652_v45, %v160_v11  ;;  %v176_v42 = vmul.f32 %v654_v46, %v160_v11  ;;  %v313_v43 = vmul.f32 %v661_v50, %v160_v11  ;;  %v314_v54 = vmul.f32 %v663_v51, %v160_v11 }
  0xc0   :  { %v381_v50 = vadd.f32 %v369_v4, %v368_v59 }
  0xc1   :  { %v185_v21 = vadd.f32 %v175_v13, %v138_v41  ;;  %v186_v48 = vadd.f32 %v176_v42, %v139_v37  ;;  %v323_v20 = vadd.f32 %v313_v43, %v296_v63  ;;  %v324_v62 = vadd.f32 %v314_v54, %v297_v38 }
  0xc3   :  { %v232_v12 = vadd.f32 %v222_v40, %v185_v21  ;;  %v233_v45 = vadd.f32 %v223_v28, %v186_v48  ;;  %v350_v14 = vadd.f32 %v340_v57, %v323_v20  ;;  %v351_v46 = vadd.f32 %v341_v8, %v324_v62 }
  0xc5   :  { %528 = vtanh.f32 %v232_v12 }
  0xc6   :  { %530 = vtanh.f32 %v233_v45 }
  0xc7   :  { %532 = vtanh.f32 %v350_v14  ;;  %382 = vadd.xlane.f32.xlu2 %v381_v50 }
  0xc8   :  { %534 = vtanh.f32 %v351_v46 }
  0xcb   :  { %v529_v51 = vpop.eup %528 }
  0xcc   :  { %v531_v60 = vpop.eup %530 }
  0xcd   :  { %v533_v36 = vpop.eup %532 }
  0xce   :  { %v535_v9 = vpop.eup %534  ;;  %v370_v23 = vadd.f32 %v533_v36, %v529_v51 }
  0xcf   :  { %v371_v16 = vadd.f32 %v535_v9, %v531_v60 }
  0xd1   :  { %v384_v18 = vadd.f32 %v371_v16, %v370_v23 }
  0xd3   :  { %385 = vadd.xlane.f32.xlu1 %v384_v18 }
 0x120   :  { %v374_v19 = vpop.xlane.xlu1 %373 }
 0x121   :  { %v387_v39 = vmul.f32 0.5, %v374_v19 }
 0x123   :  { %v392_v22 = vadd.f32 256.0, %v387_v39 }
 0x125   :  { %v397_v24 = vmul.f32 %v392_v22, %v580_v1 }
 0x127   :  { %v380_v25 = vpop.xlane.xlu0 %379  ;;  %407 = vrot.lane.b32.xlu2 %v397_v24, %s555_s0 }
 0x128   :  { %v389_v26 = vmul.f32 0.5, %v380_v25 }
 0x12a   :  { %v394_v47 = vadd.f32 256.0, %v389_v26 }
 0x12c   :  { %v399_v53 = vmul.f32 %v394_v47, %v575_v0 }
 0x12e   :  { %411 = vrot.lane.b32.xlu1 %v399_v53, %s555_s0 }
 0x132   :  { %v377_v17 = vpop.xlane.xlu2 %376 }
 0x133   :  { %v388_v55 = vmul.f32 0.5, %v377_v17 }
 0x135   :  { %v393_v56 = vadd.f32 256.0, %v388_v55 }
 0x137   :  { %v398_v15 = vmul.f32 %v393_v56, %v585_v2 }
 0x139   :  { %409 = vrot.lane.b32.xlu0 %v398_v15, %s555_s0 }
 0x13a   :  { %v383_v58 = vpop.xlane.xlu2 %382 }
 0x13b   :  { %v390_v27 = vmul.f32 0.5, %v383_v58 }
 0x13d   :  { %v395_v61 = vadd.f32 256.0, %v390_v27 }
 0x13f   :  { %v400_v44 = vmul.f32 %v395_v61, %v816_v29 }
 0x141   :  { %413 = vrot.lane.b32.xlu0 %v400_v44, %s555_s0 }
 0x146   :  { %v386_v1 = vpop.xlane.xlu1 %385 }
 0x147   :  { %v391_v49 = vmul.f32 0.5, %v386_v1 }
 0x149   :  { %v396_v52 = vadd.f32 256.0, %v391_v49 }
 0x14b   :  { %v401_v3 = vmul.f32 %v396_v52, %v817_v31 }
 0x14d   :  { %415 = vrot.lane.b32.xlu2 %v401_v3, %s555_s0 }
 0x181   :  { %v408_v0 = vpop.permute.xlu2 %407 }
 0x182   :  { %v423_v7 = vsel %vm422_vm0, %v408_v0, 0.0 }
 0x1a0   :  { %v412_v34 = vpop.permute.xlu1 %411 }
 0x1a1   :  { %v426_v10 = vsel %vm422_vm0, %v412_v34, 0.0 }
 0x1a7   :  { %v416_v35 = vpop.permute.xlu2 %415 }
 0x1a8   :  { %v430_v41 = vsel %vm422_vm0, %v416_v35, 0.0 }
 0x1ab   :  { %v410_v6 = vpop.permute.xlu0 %409 }
 0x1ac   :  { %v424_v32 = vsel %vm422_vm0, %v410_v6, 0.0 }
 0x1ad   :  { %v425_v2 = vadd.f32 %v424_v32, %v423_v7 }
 0x1af   :  { %v427_v30 = vadd.f32 %v426_v10, %v425_v2 }
 0x1b3   :  { %v414_v5 = vpop.permute.xlu0 %413 }
 0x1b4   :  { %v428_v40 = vsel %vm422_vm0, %v414_v5, 0.0 }
 0x1b5   :  { %v429_v33 = vadd.f32 %v428_v40, %v427_v30 }
 0x1b7   :  { %v431_v37 = vadd.f32 %v430_v41, %v429_v33 }
 0x1b9   :  { %432 = vadd.xlane.f32.xlu1 %v431_v37 }
 0x22c   :  { %v433_v63 = vpop.xlane.xlu1 %432 }
 0x22d   :  { %v434_v38 = vrot.slane %v433_v63, 4 }
 0x22f   :  { %v435_v11 = vadd.f32 %v434_v38, %v433_v63 }
 0x231   :  { %v436_v13 = vrot.slane %v435_v11, 2 }
 0x233   :  { %v437_v42 = vadd.f32 %v436_v13, %v435_v11 }
 0x235   :  { %v438_v43 = vrot.slane %v437_v42, 1 }
 0x237   :  { %v439_v54 = vadd.f32 %v438_v43, %v437_v42 }
 0x239   :  { %465 = vpush %v439_v54 }
 0x26a   :  { %s466_s9 = spop %465 }
 0x26b   :  { %442 = sst [smem:[#allocation2]] %s466_s9 }
 0x26c   :  { %451 = dma.smem_to_hbm %s556_s10, 16, %s449_s8, [#allocation3]  }
 0x26d   :  { %548 = dma.done.wait [#allocation3], 16  }
 0x26e   :  { %549 = vsyncadd [#allocation3], 4294967280 }
 0x26f   :  { %456 = sfence }
 0x270   :  { %457 = vsyncpa [#allocation3], 1 }

</bundles_post_ra>
